<compile_context>
chip_gen: v7x
topology: tpu7x:2x2x1
jax: 0.10.0
libtpu: 0.0.40
codegen_flags: <defaults>
</compile_context>

<pallas_src>
import jax
import jax.numpy as jnp
from jax.experimental import pallas as pl
from jax.experimental.pallas import tpu as pltpu


def _lpe_kernel(x_ref, scale_ref, out_ref):
    # x_ref:     (TN, D)
    # scale_ref: (F,  D)   precomputed pi * 2**frequencies
    # out_ref:   (TN, D*(2F+1)) laid out as [ x | sin slabs F-major | cos slabs F-major ]
    x = x_ref[...]                                   # (TN, D)
    d = x.shape[1]
    nf = scale_ref.shape[0]

    out_ref[:, :d] = x

    # Static loop over frequencies: each iteration is pure VPU/EUP work on a
    # lane-aligned (TN, D) slab with an aligned column store (for D % 128 == 0).
    for fi in range(nf):
        enc = x * scale_ref[fi:fi + 1, :]            # (TN, D)
        out_ref[:, d * (1 + fi):d * (2 + fi)] = jnp.sin(enc)
        out_ref[:, d * (1 + nf + fi):d * (2 + nf + fi)] = jnp.cos(enc)


def learned_positional_encoding(x, frequencies, *, tile_n=512):
    """x: (N, D); frequencies: (F, D) -> (N, D*(2F+1)).

    Matches LearnedPositionalEncoding.forward (frequencies[None] squeezed).
    """
    n, d = x.shape
    nf = frequencies.shape[0]
    d_out = d * (2 * nf + 1)

    # Hoist the exp2 scaling off the kernel's EUP slot.
    scale = (jnp.float32(jnp.pi) * jnp.exp2(frequencies)).astype(x.dtype)

    # Effective row tile: at most tile_n, sublane-aligned (multiple of 8),
    # never larger than needed for small N.
    tn = min(tile_n, pl.cdiv(n, 8) * 8)
    n_pad = pl.cdiv(n, tn) * tn
    if n_pad != n:
        x = jnp.pad(x, ((0, n_pad - n), (0, 0)))

    # TODO(synk): for small d_input (e.g. d=3) the per-F column slices start at
    # unaligned lane offsets -> masked stores; a lane-dense (transposed) output
    # layout would be needed for peak BW in that regime. Correct either way.

    out = pl.pallas_call(
        _lpe_kernel,
        out_shape=jax.ShapeDtypeStruct((n_pad, d_out), x.dtype),
        grid_spec=pltpu.PrefetchScalarGridSpec(
            num_scalar_prefetch=0,
            grid=(n_pad // tn,),
            in_specs=[
                pl.BlockSpec((tn, d), lambda i: (i, 0)),   # row tile of x
                pl.BlockSpec((nf, d), lambda i: (0, 0)),   # full scale, resident
            ],
            out_specs=pl.BlockSpec((tn, d_out), lambda i: (i, 0)),
        ),
        compiler_params=pltpu.CompilerParams(
            dimension_semantics=("parallel",),
        ),
    )(x, scale)

    return out[:n] if n_pad != n else out


def _reference(x, frequencies):
    enc = x[:, None, :] * jnp.pi * jnp.exp2(frequencies)
    enc = enc.reshape(x.shape[0], -1)
    return jnp.concatenate([x, jnp.sin(enc), jnp.cos(enc)], axis=-1)


if __name__ == "__main__":
    key = jax.random.PRNGKey(0)
    k_freq, k_x, k_x2 = jax.random.split(key, 3)

    num_freqs = 4
    d_input = 128
    batch = 16

    # Deterministic "learned" parameter (torch.randn analogue).
    frequencies = jax.random.normal(k_freq, (num_freqs, d_input), dtype=jnp.float32)
    x = jax.random.normal(k_x, (batch, d_input), dtype=jnp.float32)

    out = learned_positional_encoding(x, frequencies)
    out = jax.block_until_ready(out)

    ref = _reference(x, frequencies)
    assert out.shape == (batch, d_input * (2 * num_freqs + 1)), out.shape
    assert jnp.allclose(out, ref, atol=1e-5, rtol=1e-5), float(jnp.max(jnp.abs(out - ref)))

    # Second check: ragged N (exercises the pad + slice path, no divisibility assert).
    batch2 = 35
    x2 = jax.random.normal(k_x2, (batch2, d_input), dtype=jnp.float32)
    out2 = jax.block_until_ready(learned_positional_encoding(x2, frequencies))
    ref2 = _reference(x2, frequencies)
    assert out2.shape == (batch2, d_input * (2 * num_freqs + 1)), out2.shape
    assert jnp.allclose(out2, ref2, atol=1e-5, rtol=1e-5), float(jnp.max(jnp.abs(out2 - ref2)))

    print("KERNEL_OK")
</pallas_src>

<mosaic_0001>
module attributes {stable_mosaic.version = 11 : i64} {
  func.func @_lpe_kernel(%arg0: i32, %arg1: memref<16x128xf32, #tpu.memory_space<vmem>>, %arg2: memref<4x128xf32, #tpu.memory_space<vmem>>, %arg3: memref<16x1152xf32, #tpu.memory_space<vmem>>) attributes {dimension_semantics = [#tpu.dimension_semantics<parallel>], iteration_bounds = array<i64: 1>, scalar_prefetch = 0 : i64, scratch_operands = 0 : i64, tpu.core_type = #tpu.core_type<tc>, window_params = [{transform_indices = @transform_0, window_bounds = array<i64: 16, 128>}, {pipeline_mode = #tpu.pipeline_mode<synchronous>, transform_indices = @transform_1, window_bounds = array<i64: 4, 128>}, {transform_indices = @transform_2, window_bounds = array<i64: 16, 1152>}]} {
    %c0 = arith.constant 0 : index
    %c0_0 = arith.constant 0 : index
    %0 = vector.load %arg1[%c0, %c0_0] : memref<16x128xf32, #tpu.memory_space<vmem>>, vector<16x128xf32>
    %c0_1 = arith.constant 0 : index
    %c0_2 = arith.constant 0 : index
    %1 = vector.load %arg3[%c0_1, %c0_2] : memref<16x1152xf32, #tpu.memory_space<vmem>>, vector<16x128xf32>
    tpu.vector_store %arg3[%c0_1, %c0_2], %0 {strides = array<i32>} : memref<16x1152xf32, #tpu.memory_space<vmem>>, vector<16x128xf32>,
    %c0_3 = arith.constant 0 : index
    %c0_4 = arith.constant 0 : index
    %2 = vector.load %arg2[%c0_3, %c0_4] : memref<4x128xf32, #tpu.memory_space<vmem>>, vector<1x128xf32>
    %3 = vector.broadcast %2 : vector<1x128xf32> to vector<16x128xf32>
    %4 = arith.mulf %0, %3 : vector<16x128xf32>
    %5 = math.sin %4 : vector<16x128xf32>
    %c0_5 = arith.constant 0 : index
    %c128 = arith.constant 128 : index
    %6 = vector.load %arg3[%c0_5, %c128] : memref<16x1152xf32, #tpu.memory_space<vmem>>, vector<16x128xf32>
    tpu.vector_store %arg3[%c0_5, %c128], %5 {strides = array<i32>} : memref<16x1152xf32, #tpu.memory_space<vmem>>, vector<16x128xf32>,
    %7 = math.cos %4 : vector<16x128xf32>
    %c0_6 = arith.constant 0 : index
    %c640 = arith.constant 640 : index
    %8 = vector.load %arg3[%c0_6, %c640] : memref<16x1152xf32, #tpu.memory_space<vmem>>, vector<16x128xf32>
    tpu.vector_store %arg3[%c0_6, %c640], %7 {strides = array<i32>} : memref<16x1152xf32, #tpu.memory_space<vmem>>, vector<16x128xf32>,
    %c1 = arith.constant 1 : index
    %c0_7 = arith.constant 0 : index
    %9 = vector.load %arg2[%c1, %c0_7] : memref<4x128xf32, #tpu.memory_space<vmem>>, vector<1x128xf32>
    %10 = vector.broadcast %9 : vector<1x128xf32> to vector<16x128xf32>
    %11 = arith.mulf %0, %10 : vector<16x128xf32>
    %12 = math.sin %11 : vector<16x128xf32>
    %c0_8 = arith.constant 0 : index
    %c256 = arith.constant 256 : index
    %13 = vector.load %arg3[%c0_8, %c256] : memref<16x1152xf32, #tpu.memory_space<vmem>>, vector<16x128xf32>
    tpu.vector_store %arg3[%c0_8, %c256], %12 {strides = array<i32>} : memref<16x1152xf32, #tpu.memory_space<vmem>>, vector<16x128xf32>,
    %14 = math.cos %11 : vector<16x128xf32>
    %c0_9 = arith.constant 0 : index
    %c768 = arith.constant 768 : index
    %15 = vector.load %arg3[%c0_9, %c768] : memref<16x1152xf32, #tpu.memory_space<vmem>>, vector<16x128xf32>
    tpu.vector_store %arg3[%c0_9, %c768], %14 {strides = array<i32>} : memref<16x1152xf32, #tpu.memory_space<vmem>>, vector<16x128xf32>,
    %c2 = arith.constant 2 : index
    %c0_10 = arith.constant 0 : index
    %16 = vector.load %arg2[%c2, %c0_10] : memref<4x128xf32, #tpu.memory_space<vmem>>, vector<1x128xf32>
    %17 = vector.broadcast %16 : vector<1x128xf32> to vector<16x128xf32>
    %18 = arith.mulf %0, %17 : vector<16x128xf32>
    %19 = math.sin %18 : vector<16x128xf32>
    %c0_11 = arith.constant 0 : index
    %c384 = arith.constant 384 : index
    %20 = vector.load %arg3[%c0_11, %c384] : memref<16x1152xf32, #tpu.memory_space<vmem>>, vector<16x128xf32>
    tpu.vector_store %arg3[%c0_11, %c384], %19 {strides = array<i32>} : memref<16x1152xf32, #tpu.memory_space<vmem>>, vector<16x128xf32>,
    %21 = math.cos %18 : vector<16x128xf32>
    %c0_12 = arith.constant 0 : index
    %c896 = arith.constant 896 : index
    %22 = vector.load %arg3[%c0_12, %c896] : memref<16x1152xf32, #tpu.memory_space<vmem>>, vector<16x128xf32>
    tpu.vector_store %arg3[%c0_12, %c896], %21 {strides = array<i32>} : memref<16x1152xf32, #tpu.memory_space<vmem>>, vector<16x128xf32>,
    %c3 = arith.constant 3 : index
    %c0_13 = arith.constant 0 : index
    %23 = vector.load %arg2[%c3, %c0_13] : memref<4x128xf32, #tpu.memory_space<vmem>>, vector<1x128xf32>
    %24 = vector.broadcast %23 : vector<1x128xf32> to vector<16x128xf32>
    %25 = arith.mulf %0, %24 : vector<16x128xf32>
    %26 = math.sin %25 : vector<16x128xf32>
    %c0_14 = arith.constant 0 : index
    %c512 = arith.constant 512 : index
    %27 = vector.load %arg3[%c0_14, %c512] : memref<16x1152xf32, #tpu.memory_space<vmem>>, vector<16x128xf32>
    tpu.vector_store %arg3[%c0_14, %c512], %26 {strides = array<i32>} : memref<16x1152xf32, #tpu.memory_space<vmem>>, vector<16x128xf32>,
    %28 = math.cos %25 : vector<16x128xf32>
    %c0_15 = arith.constant 0 : index
    %c1024 = arith.constant 1024 : index
    %29 = vector.load %arg3[%c0_15, %c1024] : memref<16x1152xf32, #tpu.memory_space<vmem>>, vector<16x128xf32>
    tpu.vector_store %arg3[%c0_15, %c1024], %28 {strides = array<i32>} : memref<16x1152xf32, #tpu.memory_space<vmem>>, vector<16x128xf32>,
    return
  }
  func.func @transform_0(%arg0: i32) -> (i32, i32) {
    %c0_i32 = arith.constant 0 : i32
    %c0_i32_0 = arith.constant 0 : i32
    return %arg0, %c0_i32 : i32, i32
  }
  func.func @transform_1(%arg0: i32) -> (i32, i32) {
    %c0_i32 = arith.constant 0 : i32
    %c0_i32_0 = arith.constant 0 : i32
    %c0_i32_1 = arith.constant 0 : i32
    return %c0_i32, %c0_i32_0 : i32, i32
  }
  func.func @transform_2(%arg0: i32) -> (i32, i32) {
    %c0_i32 = arith.constant 0 : i32
    %c0_i32_0 = arith.constant 0 : i32
    return %arg0, %c0_i32 : i32, i32
  }
}

</mosaic_0001>

<bundles_post_ra>
// kernel: tpu_custom_call.1
= control target key start
LH: loop header
LB: loop body
LE: loop exit
PB: predicated region body
PF: predicated region fallthrough
CT: control target
= control target key end

     0   :  { %7 = vsyncpa [#allocation3], 0  ;;  %s2808_s0 = inlined_call_operand.hbm [shape: f32[16,128], index: 0, kind: input, shape index: {}]   ;;  %s2809_s1 = inlined_call_operand.hbm [shape: f32[4,128], index: 1, kind: input, shape index: {}]   ;;  %s2810_s2 = inlined_call_operand.hbm [shape: f32[16,1152], index: 2, kind: output, shape index: {}]  }
   0x1   :  { %8 = vsyncpa [#allocation6], 0 }
   0x2   :  { %9 = vsyncpa [#allocation4], 0  ;;  %s1977_s9 = smov [#allocation2]   ;;  %s1905_s13 = scalar_lea.hbm %s2808_s0, 256 }
   0x3   :  { %s15_s10 = sshll.u32 %s1977_s9, 4  ;;  %p1906_p0 = scmp.ne.s32.totalorder %s2808_s0, %s1905_s13  ;;  %s16_s10 = int_to_ptr.vmem [resolvable:$true] %s15_s10 }
   0x4   :  { %p1909_p1 = scmp.lt.u32.totalorder %s1905_s13, %s2808_s0 }
   0x6   :  { %p1911_p2 = pnand %p1909_p1, %p1906_p0 }
   0x8   :  { %1914 = shalt.err (!%p1911_p2)
}
   0x9   :  { %s1915_s18 = scalar_lea.vmem %s16_s10, 256  ;;  %p1920_p4 = scmp.lt.s32.totalorder %s16_s10, %s16_s10 }
   0xa   :  { %p1916_p3 = scmp.ne.s32.totalorder %s16_s10, %s1915_s18  ;;  %p1921_p5 = scmp.lt.s32.totalorder %s1915_s18, %s1915_s18 }
   0xc   :  { %p1922_p6 = por %p1921_p5, %p1920_p4 }
   0xe   :  { %p1923_p7 = pnand %p1922_p6, %p1916_p3 }
  0x10   :  { %1926 = shalt.err (!%p1923_p7)
}
  0x11   :  { %s1978_s19 = smov 128   ;;  %s1979_s20 = smov 8  }
  0x12   :  { %21 = dma.hbm_to_vmem [thread:$0]  %s2808_s0, 256, %s16_s10, [#allocation3], %s1978_s19, %s1978_s19, %s1979_s20  }
  0x13   :  { %s1980_s23 = smov [#allocation5]   ;;  %s1927_s27 = scalar_lea.hbm %s2809_s1, 64 }
  0x14   :  { %s28_s24 = sshll.u32 %s1980_s23, 4  ;;  %p1928_p8 = scmp.ne.s32.totalorder %s2809_s1, %s1927_s27  ;;  %s29_s24 = int_to_ptr.vmem [resolvable:$true] %s28_s24 }
  0x15   :  { %p1931_p9 = scmp.lt.u32.totalorder %s1927_s27, %s2809_s1 }
  0x17   :  { %p1933_p10 = pnand %p1931_p9, %p1928_p8 }
  0x19   :  { %1936 = shalt.err (!%p1933_p10)
}
  0x1a   :  { %s1937_s4 = scalar_lea.vmem %s29_s24, 64  ;;  %p1942_p12 = scmp.lt.s32.totalorder %s29_s24, %s29_s24 }
  0x1b   :  { %p1938_p11 = scmp.ne.s32.totalorder %s29_s24, %s1937_s4  ;;  %p1943_p13 = scmp.lt.s32.totalorder %s1937_s4, %s1937_s4 }
  0x1d   :  { %p1944_p0 = por %p1943_p13, %p1942_p12 }
  0x1f   :  { %p1945_p1 = pnand %p1944_p0, %p1938_p11 }
  0x21   :  { %1948 = shalt.err (!%p1945_p1)
}
  0x22   :  { %31 = dma.hbm_to_vmem [thread:$0]  %s2809_s1, 64, %s29_s24, [#allocation6]  }
  0x23   :  { %1971 = dma.done.wait [#allocation3], 256  }
  0x24   :  { %1972 = vsyncadd [#allocation3], 4294967040 }
  0x25   :  { %1973 = dma.done.wait [#allocation6], 64  }
  0x26   :  { %1974 = vsyncadd [#allocation6], 4294967232  ;;  %v38_v0 = vld [vmem:[#allocation2] sm:$0xff]  ;;  %v1760_v1 = vld [vmem:[#allocation5] ss:$0 sm:$0xff]  ;;  %s1987_s1 = smov [#allocation7]  }
  0x27   :  { %v1777_v2 = vld [vmem:[#allocation5 + $0x1] ss:$0 sm:$0xff]  ;;  %40 = vst [vmem:[#allocation7] sm:$0xff] %v38_v0  ;;  %v2029_v3 = vmul.f32 %v1760_v1, %v38_v0  ;;  %v39_v4 = vld [vmem:[#allocation2 + $0x8] sm:$0xff]  ;;  %v1794_v8 = vld [vmem:[#allocation5 + $0x2] ss:$0 sm:$0xff] }
  0x28   :  { %41 = vst [vmem:[#allocation7 + $0x48] sm:$0xff] %v39_v4  ;;  %v2031_v5 = vmul.f32 %v1760_v1, %v39_v4  ;;  %v2034_v7 = vmul.f32 %v1777_v2, %v38_v0  ;;  %v2038_v14 = vmul.f32 %v1794_v8, %v38_v0  ;;  %v1811_v15 = vld [vmem:[#allocation5 + $0x3] ss:$0 sm:$0xff]  ;;  %v2042_v19 = vmul.f32 %v1777_v2, %v39_v4  ;;  %s1747_s6 = sshll.u32 %s1987_s1, 4  ;;  %s1748_s6 = int_to_ptr.vmem [resolvable:$true] %s1747_s6 }
  0x29   :  { %v52_v6 = vand.u32 2139095040, %v2029_v3  ;;  %v2040_v18 = vmul.f32 %v1811_v15, %v38_v0  ;;  %v2044_v20 = vmul.f32 %v1794_v8, %v39_v4  ;;  %v2047_v23 = vmul.f32 %v1811_v15, %v39_v4  ;;  %s1949_s7 = scalar_lea.vmem %s1748_s6, 2304  ;;  %p1954_p3 = scmp.lt.s32.totalorder %s1748_s6, %s1748_s6 }
  0x2a   :  { %v156_v9 = vand.u32 2139095040, %v2031_v5  ;;  %v477_v13 = vand.u32 2139095040, %v2034_v7  ;;  %v902_v22 = vand.u32 2139095040, %v2038_v14  ;;  %v581_v27 = vand.u32 2139095040, %v2042_v19  ;;  %p1950_p2 = scmp.ne.s32.totalorder %s1748_s6, %s1949_s7  ;;  %p1955_p4 = scmp.lt.s32.totalorder %s1949_s7, %s1949_s7 }
  0x2b   :  { %v53_v10 = vshrl.u32 %v52_v6, 23  ;;  %v1327_v26 = vand.u32 2139095040, %v2040_v18  ;;  %v1006_v28 = vand.u32 2139095040, %v2044_v20  ;;  %v1431_v31 = vand.u32 2139095040, %v2047_v23 }
  0x2c   :  { %v157_v11 = vshrl.u32 %v156_v9, 23  ;;  %v478_v21 = vshrl.u32 %v477_v13, 23  ;;  %v903_v30 = vshrl.u32 %v902_v22, 23  ;;  %v582_v34 = vshrl.u32 %v581_v27, 23  ;;  %p1956_p5 = por %p1955_p4, %p1954_p3 }
  0x2d   :  { %v1761_v12 = vadd.s32 4294967169, %v53_v10  ;;  %v2053_v33 = vshrl.u32 %v1327_v26, 23  ;;  %v2055_v35 = vshrl.u32 %v1006_v28, 23  ;;  %v49_v36 = vand.u32 2147483647, %v2029_v3 }
  0x2e   :  { %v1765_v17 = vadd.s32 4294967169, %v157_v11  ;;  %v1778_v29 = vadd.s32 4294967169, %v478_v21  ;;  %v1795_v39 = vadd.s32 4294967169, %v903_v30  ;;  %v2060_v40 = vshrl.u32 %v1431_v31, 23  ;;  %p1957_p6 = pnand %p1956_p5, %p1950_p2 }
  0x2f   :  { %v59_v16 = vadd.s32 1, %v1761_v12  ;;  %v56_v42 = vand.u32 8388607, %v49_v36  ;;  %v1981_v44 = vmov 683565275   ;;  %v1782_v22 = vadd.s32 4294967169, %v582_v34 }
  0x30   :  { %v163_v25 = vadd.s32 1, %v1765_v17  ;;  %v2058_v38 = vadd.s32 1, %v1778_v29  ;;  %v1982_v46 = vmov 2475754826   ;;  %v1983_v48 = vmov 2131351028  }
  0x31   :  { %vm60_vm0 = vcmp.gt.s32.totalorder %v59_v16, 0  ;;  %v1984_v50 = vmov 2102212464   ;;  %v1985_v52 = vmov 920167782   ;;  %v57_v54 = vor.u32 8388608, %v56_v42 }
  0x32   :  { %v61_v24 = vsel %vm60_vm0, %v59_v16, 0  ;;  %vm164_vm1 = vcmp.gt.s32.totalorder %v163_v25, 0  ;;  %v1986_v60 = vmov 1326507024   ;;  %v153_v21 = vand.u32 2147483647, %v2031_v5 }
  0x33   :  { %v63_v32 = vand.u32 31, %v61_v24  ;;  %v62_v37 = vshrl.u32 %v61_v24, 5  ;;  %v165_v41 = vsel %vm164_vm1, %v163_v25, 0  ;;  %v97_v9 = vshll.u32 %v57_v54, 8 }
  0x34   :  { %v167_v62 = vand.u32 31, %v165_v41  ;;  %v2083_v31 = vadd.s32 1, %v1795_v39  ;;  %vm485_vm6 = vcmp.gt.s32.totalorder %v2058_v38, 0  ;;  %vm51_vm15 = vcmp.lt.s32.totalorder %v2029_v3, 0 }
  0x35   :  { %v64_v43 = vsub.s32 32, %v63_v32  ;;  %v66_v45 = vshll.u32 %v1981_v44, %v63_v32  ;;  %v69_v47 = vshll.u32 %v1982_v46, %v63_v32  ;;  %v72_v49 = vshll.u32 %v1983_v48, %v63_v32 }
  0x36   :  { %v75_v51 = vshll.u32 %v1984_v50, %v63_v32  ;;  %v78_v53 = vshll.u32 %v1985_v52, %v63_v32  ;;  %vm81_vm2 = vcmp.lt.s32.totalorder %v62_v37, 1  ;;  %vm83_vm3 = vcmp.lt.s32.totalorder %v62_v37, 3 }
  0x37   :  { %v65_v55 = vshrl.u32 %v1981_v44, %v64_v43  ;;  %v67_v56 = vshrl.u32 %v1982_v46, %v64_v43  ;;  %v70_v57 = vshrl.u32 %v1983_v48, %v64_v43  ;;  %v73_v58 = vshrl.u32 %v1984_v50, %v64_v43 }
  0x38   :  { %v76_v59 = vshrl.u32 %v1985_v52, %v64_v43  ;;  %v79_v61 = vshrl.u32 %v1986_v60, %v64_v43  ;;  %vm84_vm4 = vcmp.lt.s32.totalorder %v62_v37, 4  ;;  %vm82_vm5 = vcmp.lt.s32.totalorder %v62_v37, 2 }
  0x39   :  { %v68_v63 = vor.u32 %v67_v56, %v66_v45  ;;  %v71_v0 = vor.u32 %v70_v57, %v69_v47  ;;  %v74_v1 = vor.u32 %v73_v58, %v72_v49  ;;  %v166_v32 = vshrl.u32 %v165_v41, 5 }
  0x3a   :  { %v77_v2 = vor.u32 %v76_v59, %v75_v51  ;;  %v80_v4 = vor.u32 %v79_v61, %v78_v53  ;;  %v160_v37 = vand.u32 8388607, %v153_v21  ;;  %v168_v42 = vsub.s32 32, %v167_v62 }
  0x3b   :  { %v85_v6 = vsel %vm81_vm2, %v65_v55, %v68_v63  ;;  %v89_v8 = vsel %vm81_vm2, %v68_v63, %v71_v0  ;;  %v86_v10 = vsel %vm84_vm4, %v74_v1, 2102212464  ;;  %v93_v12 = vsel %vm81_vm2, %v71_v0, %v74_v1 }
  0x3c   :  { %v90_v11 = vsel %vm84_vm4, %v77_v2, 920167782  ;;  %v94_v13 = vsel %vm84_vm4, %v80_v4, 1326507024  ;;  %v87_v15 = vsel %vm83_vm3, %v71_v0, %v86_v10  ;;  %v170_v43 = vshll.u32 %v1981_v44, %v167_v62 }
  0x3d   :  { %v91_v16 = vsel %vm83_vm3, %v74_v1, %v90_v11  ;;  %v95_v17 = vsel %vm83_vm3, %v77_v2, %v94_v13  ;;  %v88_v24 = vsel %vm82_vm5, %v85_v6, %v87_v15  ;;  %v173_v45 = vshll.u32 %v1982_v46, %v167_v62 }
  0x3e   :  { %v92_v25 = vsel %vm82_vm5, %v89_v8, %v91_v16  ;;  %v96_v26 = vsel %vm82_vm5, %v93_v12, %v95_v17  ;;  %v104_v34 = vmul.u32 %v97_v9, %v88_v24  ;;  %v176_v47 = vshll.u32 %v1983_v48, %v167_v62 }
  0x3f   :  { %v2076_v27 = vmul.u32.u64.low %v97_v9, %v96_v26  ;;  %v2077_v28 = vmul.u32.u64.high %v97_v9, %v96_v26, %v2076_v27  ;;  %v2079_v29 = vmul.u32.u64.low %v97_v9, %v92_v25  ;;  %v2080_v30 = vmul.u32.u64.high %v97_v9, %v92_v25, %v2079_v29 }
  0x40   :  { %v161_v49 = vor.u32 8388608, %v160_v37  ;;  %v171_v51 = vshrl.u32 %v1982_v46, %v168_v42  ;;  %v174_v39 = vshrl.u32 %v1983_v48, %v168_v42  ;;  %v179_v41 = vshll.u32 %v1984_v50, %v167_v62 }
  0x41   :  { %vm106_vm7 = vc.u32 %v2077_v28, %v2079_v29  ;;  %v107_v53 = vadd.s32 1, %v2080_v30  ;;  %v169_v54 = vshrl.u32 %v1981_v44, %v168_v42  ;;  %v177_v55 = vshrl.u32 %v1984_v50, %v168_v42 }
  0x42   :  { %v172_v56 = vor.u32 %v171_v51, %v170_v43  ;;  %v175_v57 = vor.u32 %v174_v39, %v173_v45  ;;  %v180_v58 = vshrl.u32 %v1985_v52, %v168_v42  ;;  %v182_v59 = vshll.u32 %v1985_v52, %v167_v62 }
  0x43   :  { %v108_v61 = vsel %vm106_vm7, %v107_v53, %v2080_v30  ;;  %v178_v63 = vor.u32 %v177_v55, %v176_v47  ;;  %v183_v0 = vshrl.u32 %v1986_v60, %v168_v42  ;;  %vm185_vm8 = vcmp.lt.s32.totalorder %v166_v32, 1 }
  0x44   :  { %v109_v1 = vadd.s32 %v108_v61, %v104_v34  ;;  %v181_v2 = vor.u32 %v180_v58, %v179_v41  ;;  %vm186_vm9 = vcmp.lt.s32.totalorder %v166_v32, 2  ;;  %vm187_vm10 = vcmp.lt.s32.totalorder %v166_v32, 3 }
  0x45   :  { %v184_v4 = vor.u32 %v183_v0, %v182_v59  ;;  %vm188_vm11 = vcmp.lt.s32.totalorder %v166_v32, 4  ;;  %v189_v6 = vsel %vm185_vm8, %v169_v54, %v172_v56  ;;  %v193_v8 = vsel %vm185_vm8, %v172_v56, %v175_v57 }
  0x46   :  { %v110_v9 = vadd.s32 536870912, %v109_v1  ;;  %v190_v10 = vsel %vm188_vm11, %v178_v63, 2102212464  ;;  %v194_v11 = vsel %vm188_vm11, %v181_v2, 920167782  ;;  %v197_v12 = vsel %vm185_vm8, %v175_v57, %v178_v63 }
  0x47   :  { %v191_v62 = vsel %vm187_vm10, %v175_v57, %v190_v10  ;;  %v195_v13 = vsel %vm187_vm10, %v178_v63, %v194_v11  ;;  %v198_v15 = vsel %vm188_vm11, %v184_v4, 1326507024  ;;  %v201_v16 = vshll.u32 %v161_v49, 8 }
  0x48   :  { %v588_v17 = vadd.s32 1, %v1782_v22  ;;  %v111_v24 = vshrl.u32 %v110_v9, 30  ;;  %v196_v25 = vsel %vm186_vm9, %v193_v8, %v195_v13  ;;  %v199_v26 = vsel %vm187_vm10, %v181_v2, %v198_v15 }
  0x49   :  { %v192_v27 = vsel %vm186_vm9, %v189_v6, %v191_v62  ;;  %v200_v30 = vsel %vm186_vm9, %v197_v12, %v199_v26  ;;  %v2109_v37 = vmul.u32.u64.low %v201_v16, %v196_v25  ;;  %v2110_v42 = vmul.u32.u64.high %v201_v16, %v196_v25, %v2109_v37 }
  0x4a   :  { %v486_v34 = vsel %vm485_vm6, %v2058_v38, 0  ;;  %v112_v43 = vshll.u32 %v111_v24, 30  ;;  %v2116_v45 = vmul.u32.u64.low %v201_v16, %v200_v30  ;;  %v2117_v22 = vmul.u32.u64.high %v201_v16, %v200_v30, %v2116_v45 }
  0x4b   :  { %v1812_v47 = vadd.s32 4294967169, %v2053_v33  ;;  %v1799_v49 = vadd.s32 4294967169, %v2055_v35  ;;  %vm910_vm12 = vcmp.gt.s32.totalorder %v2083_v31, 0  ;;  %vm589_vm13 = vcmp.gt.s32.totalorder %v588_v17, 0 }
  0x4c   :  { %v113_v32 = vsub.s32 %v109_v1, %v112_v43  ;;  %v208_v51 = vmul.u32 %v201_v16, %v192_v27  ;;  %v488_v39 = vand.u32 31, %v486_v34  ;;  %v1816_v41 = vadd.s32 4294967169, %v2060_v40 }
  0x4d   :  { %v135_v53 = vsub.s32 4, %v111_v24  ;;  %v211_v54 = vadd.s32 1, %v2110_v42  ;;  %vm210_vm14 = vc.u32 %v2117_v22, %v2109_v37  ;;  %v2127_v55 = vsel %vm910_vm12, %v2083_v31, 0 }
  0x4e   :  { %v115_v38 = vsub.s32 0, %v113_v32  ;;  %v2129_v33 = vadd.s32 1, %v1812_v47  ;;  %v590_v35 = vsel %vm589_vm13, %v588_v17, 0  ;;  %v2132_v57 = vadd.s32 1, %v1799_v49 }
  0x4f   :  { %v212_v56 = vsel %vm210_vm14, %v211_v54, %v2110_v42  ;;  %v2135_v59 = vshrl.u32 %v486_v34, 5  ;;  %v2137_v61 = vadd.s32 1, %v1816_v41  ;;  %v136_v63 = vsel %vm51_vm15, %v135_v53, %v111_v24 }
  0x50   :  { %v1762_v40 = vmin.u32 %v115_v38, %v113_v32  ;;  %v213_v58 = vadd.s32 %v212_v56, %v208_v51  ;;  %v489_v31 = vsub.s32 32, %v488_v39  ;;  %v2142_v0 = vand.u32 31, %v2127_v55 }
  0x51   :  { %v2144_v1 = vshrl.u32 %v590_v35, 5  ;;  %v2146_v2 = vand.u32 31, %v590_v35  ;;  %vm2150_vm0 = vcmp.le.f32.partialorder %v49_v36, 0.7853982  ;;  %v105_v8 = vadd.s32 %v2079_v29, %v2077_v28 }
  0x52   :  { %v117_v4 = vclz %v1762_v40  ;;  %v214_v9 = vadd.s32 536870912, %v213_v58  ;;  %v474_v10 = vand.u32 2147483647, %v2034_v7  ;;  %v138_v12 = vsel %vm2150_vm0, 0, %v136_v63 }
  0x53   :  { %v491_v62 = vshll.u32 %v1981_v44, %v488_v39  ;;  %v494_v13 = vshll.u32 %v1982_v46, %v488_v39  ;;  %v492_v36 = vshrl.u32 %v1982_v46, %v489_v31  ;;  %v495_v16 = vshrl.u32 %v1983_v48, %v489_v31 }
  0x54   :  { %v1763_v11 = vadd.s32 4294967294, %v117_v4  ;;  %v2161_v15 = vshrl.u32 %v214_v9, 30  ;;  %v497_v17 = vshll.u32 %v1983_v48, %v488_v39  ;;  %v498_v28 = vshrl.u32 %v1984_v50, %v489_v31 }
  0x55   :  { %v500_v29 = vshll.u32 %v1984_v50, %v488_v39  ;;  %v501_v24 = vshrl.u32 %v1985_v52, %v489_v31  ;;  %v481_v27 = vand.u32 8388607, %v474_v10  ;;  %v503_v30 = vshll.u32 %v1985_v52, %v488_v39 }
  0x56   :  { %vm1764_vm1 = vcmp.lt.s32.totalorder %v1763_v11, 0  ;;  %v216_v26 = vshll.u32 %v2161_v15, 30  ;;  %v504_v45 = vshrl.u32 %v1986_v60, %v489_v31  ;;  %v142_v47 = vadd.s32 3, %v138_v12 }
  0x57   :  { %v120_v25 = vsel %vm1764_vm1, 0, %v1763_v11  ;;  %v493_v51 = vor.u32 %v492_v36, %v491_v62  ;;  %v496_v41 = vor.u32 %v495_v16, %v494_v13  ;;  %v499_v38 = vor.u32 %v498_v28, %v497_v17 }
  0x58   :  { %v121_v42 = vsub.s32 32, %v120_v25  ;;  %v122_v34 = vshll.u32 %v113_v32, %v120_v25  ;;  %v125_v43 = vsub.s32 4294967266, %v120_v25  ;;  %v2174_v49 = vsub.s32 %v213_v58, %v216_v26 }
  0x59   :  { %v502_v35 = vor.u32 %v501_v24, %v500_v29  ;;  %v490_v40 = vshrl.u32 %v1981_v44, %v489_v31  ;;  %vm506_vm2 = vcmp.lt.s32.totalorder %v2135_v59, 1  ;;  %vm509_vm3 = vcmp.lt.s32.totalorder %v2135_v59, 4 }
  0x5a   :  { %v123_v53 = vshrl.u32 %v105_v8, %v121_v42  ;;  %v126_v54 = vadd.s32 127, %v125_v43  ;;  %v219_v56 = vsub.s32 0, %v2174_v49  ;;  %v505_v63 = vor.u32 %v504_v45, %v503_v30 }
  0x5b   :  { %v511_v58 = vsel %vm509_vm3, %v499_v38, 2102212464  ;;  %vm155_vm4 = vcmp.lt.s32.totalorder %v2031_v5, 0  ;;  %v482_v8 = vor.u32 8388608, %v481_v27  ;;  %vm507_vm5 = vcmp.lt.s32.totalorder %v2135_v59, 2 }
  0x5c   :  { %v124_v32 = vor.u32 %v123_v53, %v122_v34  ;;  %v127_v39 = vshll.u32 %v126_v54, 23  ;;  %v1766_v4 = vmin.u32 %v219_v56, %v2174_v49  ;;  %vm508_vm6 = vcmp.lt.s32.totalorder %v2135_v59, 3 }
  0x5d   :  { %v514_v11 = vsel %vm506_vm2, %v493_v51, %v496_v41  ;;  %v515_v62 = vsel %vm509_vm3, %v502_v35, 920167782  ;;  %v209_v13 = vadd.s32 %v2109_v37, %v2117_v22  ;;  %v510_v16 = vsel %vm506_vm2, %v490_v40, %v493_v51 }
  0x5e   :  { %v128_v31 = vor.u32 4788187, %v127_v39  ;;  %v131_v9 = vcvt.s32.f32 %v124_v32  ;;  %v221_v36 = vclz %v1766_v4  ;;  %v512_v17 = vsel %vm508_vm6, %v496_v41, %v511_v58 }
  0x5f   :  { %v516_v29 = vsel %vm508_vm6, %v499_v38, %v515_v62  ;;  %v518_v24 = vsel %vm506_vm2, %v496_v41, %v499_v38  ;;  %v519_v25 = vsel %vm509_vm3, %v505_v63, 1326507024  ;;  %v522_v42 = vshll.u32 %v482_v8, 8 }
  0x60   :  { %v129_v28 = vand.u32 2147483647, %v128_v31  ;;  %v1767_v26 = vadd.s32 4294967294, %v221_v36  ;;  %v517_v27 = vsel %vm507_vm5, %v514_v11, %v516_v29  ;;  %v520_v30 = vsel %vm508_vm6, %v502_v35, %v519_v25 }
  0x61   :  { %v239_v22 = vsub.s32 4, %v2161_v15  ;;  %v2201_v34 = vand.u32 3, %v138_v12  ;;  %v521_v43 = vsel %vm507_vm5, %v518_v24, %v520_v30  ;;  %v513_v45 = vsel %vm507_vm5, %v510_v16, %v512_v17 }
  0x62   :  { %v132_v37 = vmul.f32 %v131_v9, %v129_v28  ;;  %vm1768_vm7 = vcmp.lt.s32.totalorder %v1767_v26, 0  ;;  %v2207_v51 = vmul.u32.u64.low %v522_v42, %v521_v43  ;;  %v2208_v41 = vmul.u32.u64.high %v522_v42, %v521_v43, %v2207_v51 }
  0x63   :  { %v224_v54 = vsel %vm1768_vm7, 0, %v1767_v26  ;;  %v2210_v38 = vmul.u32.u64.low %v522_v42, %v517_v27  ;;  %v2211_v35 = vmul.u32.u64.high %v522_v42, %v517_v27, %v2210_v38  ;;  %v2214_v56 = vand.u32 3, %v142_v47 }
  0x64   :  { %v133_v53 = vxor.u32 2147483648, %v132_v37  ;;  %v225_v12 = vsub.s32 32, %v224_v54  ;;  %v226_v40 = vshll.u32 %v2174_v49, %v224_v54  ;;  %v229_v32 = vsub.s32 4294967266, %v224_v54 }
  0x65   :  { %v240_v59 = vsel %vm155_vm4, %v239_v22, %v2161_v15  ;;  %v578_v63 = vand.u32 2147483647, %v2042_v19  ;;  %v593_v58 = vsub.s32 32, %v2146_v2  ;;  %v529_v31 = vmul.u32 %v522_v42, %v513_v45 }
  0x66   :  { %v134_v39 = vsel %vm51_vm15, %v133_v53, %v132_v37  ;;  %v227_v4 = vshrl.u32 %v209_v13, %v225_v12  ;;  %v230_v8 = vadd.s32 127, %v229_v32  ;;  %vm2229_vm8 = vcmp.le.f32.partialorder %v153_v21, 0.7853982 }
  0x67   :  { %v137_v47 = vsel %vm2150_vm0, %v2029_v3, %v134_v39  ;;  %vm531_vm9 = vc.u32 %v2208_v41, %v2210_v38  ;;  %v532_v15 = vadd.s32 1, %v2211_v35  ;;  %v242_v6 = vsel %vm2229_vm8, 0, %v240_v59 }
  0x68   :  { %1873 = vcosq.f32 %v137_v47  ;;  %v228_v9 = vor.u32 %v227_v4, %v226_v40  ;;  %v231_v11 = vshll.u32 %v230_v8, 23  ;;  %vm357_vm10 = vcmp.eq.s32.totalorder %v2201_v34, 2 }
  0x69   :  { %1875 = vsinq.f32 %v137_v47  ;;  %v533_v62 = vsel %vm531_vm9, %v532_v15, %v2211_v35  ;;  %v2242_v21 = vand.u32 8388607, %v578_v63  ;;  %v595_v13 = vshll.u32 %v1981_v44, %v2146_v2 }
  0x6a   :  { %v596_v36 = vshrl.u32 %v1982_v46, %v593_v58  ;;  %vm145_vm11 = vcmp.eq.s32.totalorder %v2214_v56, 0  ;;  %v232_v16 = vor.u32 4788187, %v231_v11  ;;  %v235_v17 = vcvt.s32.f32 %v228_v9 }
  0x6b   :  { %vm354_vm12 = vcmp.eq.s32.totalorder %v2201_v34, 0  ;;  %v534_v28 = vadd.s32 %v533_v62, %v529_v31  ;;  %v598_v29 = vshll.u32 %v1982_v46, %v2146_v2  ;;  %vm144_vm13 = vcmp.lt.s32.totalorder %v2214_v56, 2 }
  0x6c   :  { %vm353_vm14 = vcmp.lt.s32.totalorder %v2201_v34, 2  ;;  %v599_v24 = vshrl.u32 %v1983_v48, %v593_v58  ;;  %v601_v25 = vshll.u32 %v1983_v48, %v2146_v2  ;;  %v602_v26 = vshrl.u32 %v1984_v50, %v593_v58 }
  0x6d   :  { %v604_v27 = vshll.u32 %v1984_v50, %v2146_v2  ;;  %vm141_vm15 = vweird.f32 %v2029_v3  ;;  %vm148_vm0 = vcmp.eq.s32.totalorder %v2214_v56, 2  ;;  %v233_v30 = vand.u32 2147483647, %v232_v16 }
  0x6e   :  { %v535_v42 = vadd.s32 536870912, %v534_v28  ;;  %v605_v37 = vshrl.u32 %v1985_v52, %v593_v58  ;;  %v246_v22 = vadd.s32 3, %v242_v6  ;;  %v594_v43 = vshrl.u32 %v1981_v44, %v593_v58 }
  0x6f   :  { %v607_v45 = vshll.u32 %v1985_v52, %v2146_v2  ;;  %v608_v51 = vshrl.u32 %v1986_v60, %v593_v58  ;;  %v236_v53 = vmul.f32 %v235_v17, %v233_v30  ;;  %v2266_v54 = vand.u32 3, %v242_v6 }
  0x70   :  { %v2268_v35 = vshrl.u32 %v535_v42, 30  ;;  %v586_v12 = vor.u32 8388608, %v2242_v21  ;;  %v597_v40 = vor.u32 %v596_v36, %v595_v13  ;;  %v600_v32 = vor.u32 %v599_v24, %v598_v29 }
  0x71   :  { %v603_v39 = vor.u32 %v602_v26, %v601_v25  ;;  %v606_v59 = vor.u32 %v605_v37, %v604_v27  ;;  %v237_v47 = vxor.u32 2147483648, %v236_v53  ;;  %vm610_vm1 = vcmp.lt.s32.totalorder %v2144_v1, 1 }
  0x72   :  { %v537_v4 = vshll.u32 %v2268_v35, 30  ;;  %vm613_vm2 = vcmp.lt.s32.totalorder %v2144_v1, 4  ;;  %v1874_v2 = vpop.eup %1873  ;;  %v609_v58 = vor.u32 %v608_v51, %v607_v45  ;;  %vm611_vm3 = vcmp.lt.s32.totalorder %v2144_v1, 2 }
  0x73   :  { %vm612_vm5 = vcmp.lt.s32.totalorder %v2144_v1, 3  ;;  %v614_v8 = vsel %vm610_vm1, %v594_v43, %v597_v40  ;;  %v1876_v31 = vpop.eup %1875  ;;  %v149_v15 = vxor.u32 2147483648, %v1874_v2  ;;  %v238_v9 = vsel %vm155_vm4, %v237_v47, %v236_v53 }
  0x74   :  { %v2280_v11 = vsub.s32 %v534_v28, %v537_v4  ;;  %v615_v6 = vsel %vm613_vm2, %v603_v39, 2102212464  ;;  %v146_v62 = vxor.u32 2147483648, %v1876_v31  ;;  %v241_v21 = vsel %vm2229_vm8, %v2031_v5, %v238_v9 }
  0x75   :  { %v618_v13 = vsel %vm610_vm1, %v597_v40, %v600_v32  ;;  %v619_v36 = vsel %vm613_vm2, %v606_v59, 920167782  ;;  %v150_v16 = vsel %vm148_vm0, %v149_v15, %v1876_v31  ;;  %1877 = vcosq.f32 %v241_v21 }
  0x76   :  { %v359_v17 = vsel %vm357_vm10, %v149_v15, %v1876_v31  ;;  %v540_v28 = vsub.s32 0, %v2280_v11  ;;  %v147_v29 = vsel %vm145_vm11, %v1874_v2, %v146_v62  ;;  %1879 = vsinq.f32 %v241_v21 }
  0x77   :  { %v356_v49 = vsel %vm354_vm12, %v1874_v2, %v146_v62  ;;  %v616_v24 = vsel %vm612_vm5, %v600_v32, %v615_v6  ;;  %v151_v25 = vsel %vm144_vm13, %v147_v29, %v150_v16  ;;  %v620_v30 = vsel %vm612_vm5, %v603_v39, %v619_v36 }
  0x78   :  { %v360_v26 = vsel %vm353_vm14, %v356_v49, %v359_v17  ;;  %v1779_v27 = vmin.u32 %v540_v28, %v2280_v11  ;;  %v152_v42 = vsel %vm141_vm15, nan, %v151_v25  ;;  %v621_v43 = vsel %vm611_vm3, %v618_v13, %v620_v30 }
  0x79   :  { %v361_v37 = vsel %vm141_vm15, nan, %v360_v26  ;;  %v622_v56 = vsel %vm610_vm1, %v600_v32, %v603_v39  ;;  %257 = vst [vmem:[#allocation7 + $0x8] sm:$0xff] %v152_v42  ;;  %vm476_vm4 = vcmp.lt.s32.totalorder %v2034_v7, 0  ;;  %v623_v45 = vsel %vm613_vm2, %v609_v58, 1326507024 }
  0x7a   :  { %465 = vst [vmem:[#allocation7 + $0x28] sm:$0xff] %v361_v37  ;;  %v542_v34 = vclz %v1779_v27  ;;  %v626_v51 = vshll.u32 %v586_v12, 8  ;;  %vm245_vm6 = vweird.f32 %v2031_v5  ;;  %v247_v53 = vand.u32 3, %v246_v22 }
  0x7b   :  { %v560_v3 = vsub.s32 4, %v2268_v35  ;;  %v617_v40 = vsel %vm611_vm3, %v614_v8, %v616_v24  ;;  %v624_v32 = vsel %vm612_vm5, %v606_v59, %v623_v45  ;;  %vm1335_vm7 = vcmp.gt.s32.totalorder %v2129_v33, 0 }
  0x7c   :  { %vm1014_vm8 = vcmp.gt.s32.totalorder %v2132_v57, 0  ;;  %v1780_v39 = vadd.s32 4294967294, %v542_v34  ;;  %v625_v47 = vsel %vm611_vm3, %v622_v56, %v624_v32  ;;  %vm456_vm9 = vcmp.lt.s32.totalorder %v2266_v54, 2 }
  0x7d   :  { %v2330_v12 = vmul.u32.u64.low %v626_v51, %v621_v43  ;;  %v2331_v4 = vmul.u32.u64.high %v626_v51, %v621_v43, %v2330_v12  ;;  %vm2337_vm10 = vcmp.le.f32.partialorder %v474_v10, 0.7853982  ;;  %vm457_vm11 = vcmp.eq.s32.totalorder %v2266_v54, 0 }
  0x7e   :  { %v2341_v59 = vmul.u32.u64.low %v626_v51, %v625_v47  ;;  %v2342_v2 = vmul.u32.u64.high %v626_v51, %v625_v47, %v2341_v59  ;;  %vm460_vm12 = vcmp.eq.s32.totalorder %v2266_v54, 2  ;;  %v530_v1 = vadd.s32 %v2210_v38, %v2208_v41 }
  0x7f   :  { %vm1781_vm13 = vcmp.lt.s32.totalorder %v1780_v39, 0  ;;  %vm252_vm14 = vcmp.eq.s32.totalorder %v247_v53, 2  ;;  %v561_v10 = vsel %vm476_vm4, %v560_v3, %v2268_v35  ;;  %v633_v8 = vmul.u32 %v626_v51, %v617_v40  ;;  %v1878_v31 = vpop.eup %1877 }
  0x80   :  { %v545_v58 = vsel %vm1781_vm13, 0, %v1780_v39  ;;  %v636_v62 = vadd.s32 1, %v2331_v4  ;;  %v1880_v21 = vpop.eup %1879  ;;  %vm248_vm15 = vcmp.lt.s32.totalorder %v247_v53, 2  ;;  %vm249_vm0 = vcmp.eq.s32.totalorder %v247_v53, 0 }
  0x81   :  { %v546_v15 = vsub.s32 32, %v545_v58  ;;  %v547_v9 = vshll.u32 %v2280_v11, %v545_v58  ;;  %v550_v6 = vsub.s32 4294967266, %v545_v58  ;;  %v253_v13 = vxor.u32 2147483648, %v1878_v31 }
  0x82   :  { %vm635_vm1 = vc.u32 %v2342_v2, %v2330_v12  ;;  %v250_v41 = vxor.u32 2147483648, %v1880_v21  ;;  %v563_v17 = vsel %vm2337_vm10, 0, %v561_v10  ;;  %v914_v42 = vsub.s32 32, %v2142_v0 }
  0x83   :  { %v548_v38 = vshrl.u32 %v530_v1, %v546_v15  ;;  %v551_v36 = vadd.s32 127, %v550_v6  ;;  %v637_v35 = vsel %vm635_vm1, %v636_v62, %v2331_v4  ;;  %v254_v16 = vsel %vm252_vm14, %v253_v13, %v1880_v21 }
  0x84   :  { %v462_v11 = vsel %vm460_vm12, %v253_v13, %v1880_v21  ;;  %v638_v28 = vadd.s32 %v637_v35, %v633_v8  ;;  %v251_v29 = vsel %vm249_vm0, %v1878_v31, %v250_v41  ;;  %v459_v49 = vsel %vm457_vm11, %v1878_v31, %v250_v41 }
  0x85   :  { %v549_v24 = vor.u32 %v548_v38, %v547_v9  ;;  %v552_v25 = vshll.u32 %v551_v36, 23  ;;  %v255_v26 = vsel %vm248_vm15, %v251_v29, %v254_v16  ;;  %v463_v27 = vsel %vm456_vm9, %v459_v49, %v462_v11 }
  0x86   :  { %v639_v30 = vadd.s32 536870912, %v638_v28  ;;  %v256_v37 = vsel %vm245_vm6, nan, %v255_v26  ;;  %v464_v43 = vsel %vm245_vm6, nan, %v463_v27  ;;  %v2372_v45 = vshrl.u32 %v2127_v55, 5 }
  0x87   :  { %v553_v56 = vor.u32 4788187, %v552_v25  ;;  %v556_v34 = vcvt.s32.f32 %v549_v24  ;;  %v2377_v51 = vsel %vm1335_vm7, %v2129_v33, 0  ;;  %v1015_v54 = vsel %vm1014_vm8, %v2132_v57, 0  ;;  %258 = vst [vmem:[#allocation7 + $0x50] sm:$0xff] %v256_v37  ;;  %466 = vst [vmem:[#allocation7 + $0x70] sm:$0xff] %v464_v43 }
  0x88   :  { %v640_v53 = vshrl.u32 %v639_v30, 30  ;;  %v2382_v3 = vshrl.u32 %v1015_v54, 5  ;;  %v567_v40 = vadd.s32 3, %v563_v17  ;;  %v899_v32 = vand.u32 2147483647, %v2038_v14 }
  0x89   :  { %v554_v5 = vand.u32 2147483647, %v553_v56  ;;  %v916_v39 = vshll.u32 %v1981_v44, %v2142_v0  ;;  %v917_v33 = vshrl.u32 %v1982_v46, %v914_v42  ;;  %v919_v47 = vshll.u32 %v1982_v46, %v2142_v0 }
  0x8a   :  { %v641_v55 = vshll.u32 %v640_v53, 30  ;;  %v920_v57 = vshrl.u32 %v1983_v48, %v914_v42  ;;  %v922_v59 = vshll.u32 %v1983_v48, %v2142_v0  ;;  %v923_v1 = vshrl.u32 %v1984_v50, %v914_v42 }
  0x8b   :  { %v557_v4 = vmul.f32 %v556_v34, %v554_v5  ;;  %v2394_v58 = vand.u32 31, %v1015_v54  ;;  %v925_v8 = vshll.u32 %v1984_v50, %v2142_v0  ;;  %v926_v31 = vshrl.u32 %v1985_v52, %v914_v42 }
  0x8c   :  { %v2396_v10 = vsub.s32 %v638_v28, %v641_v55  ;;  %vm580_vm2 = vcmp.lt.s32.totalorder %v2042_v19, 0  ;;  %v906_v9 = vand.u32 8388607, %v899_v32  ;;  %v928_v6 = vshll.u32 %v1985_v52, %v2142_v0 }
  0x8d   :  { %v558_v15 = vxor.u32 2147483648, %v557_v4  ;;  %v929_v62 = vshrl.u32 %v1986_v60, %v914_v42  ;;  %v2407_v21 = vand.u32 3, %v567_v40  ;;  %v2410_v41 = vand.u32 3, %v563_v17 }
  0x8e   :  { %v644_v13 = vsub.s32 0, %v2396_v10  ;;  %v915_v38 = vshrl.u32 %v1981_v44, %v914_v42  ;;  %v918_v35 = vor.u32 %v917_v33, %v916_v39  ;;  %v921_v16 = vor.u32 %v920_v57, %v919_v47 }
  0x8f   :  { %v559_v36 = vsel %vm476_vm4, %v558_v15, %v557_v4  ;;  %v924_v11 = vor.u32 %v923_v1, %v922_v59  ;;  %v927_v29 = vor.u32 %v926_v31, %v925_v8  ;;  %vm931_vm3 = vcmp.lt.s32.totalorder %v2372_v45, 1 }
  0x90   :  { %v562_v0 = vsel %vm2337_vm10, %v2034_v7, %v559_v36  ;;  %v1783_v28 = vmin.u32 %v644_v13, %v2396_v10  ;;  %v907_v17 = vor.u32 8388608, %v906_v9  ;;  %v930_v49 = vor.u32 %v929_v62, %v928_v6 }
  0x91   :  { %1881 = vcosq.f32 %v562_v0  ;;  %vm934_vm5 = vcmp.lt.s32.totalorder %v2372_v45, 4  ;;  %vm2423_vm4 = vcmp.le.f32.partialorder %v578_v63, 0.7853982  ;;  %v664_v22 = vsub.s32 4, %v640_v53 }
  0x92   :  { %1883 = vsinq.f32 %v562_v0  ;;  %v646_v25 = vclz %v1783_v28  ;;  %vm933_vm6 = vcmp.lt.s32.totalorder %v2372_v45, 3  ;;  %v634_v26 = vadd.s32 %v2330_v12, %v2342_v2 }
  0x93   :  { %vm932_vm7 = vcmp.lt.s32.totalorder %v2372_v45, 2  ;;  %v936_v27 = vsel %vm934_vm5, %v924_v11, 2102212464  ;;  %v939_v30 = vsel %vm931_vm3, %v918_v35, %v921_v16  ;;  %vm570_vm8 = vcmp.eq.s32.totalorder %v2407_v21, 0 }
  0x94   :  { %v1784_v63 = vadd.s32 4294967294, %v646_v25  ;;  %v935_v42 = vsel %vm931_vm3, %v915_v38, %v918_v35  ;;  %v940_v37 = vsel %vm934_vm5, %v927_v29, 920167782  ;;  %v943_v12 = vsel %vm931_vm3, %v921_v16, %v924_v11 }
  0x95   :  { %vm569_vm9 = vcmp.lt.s32.totalorder %v2407_v21, 2  ;;  %v937_v2 = vsel %vm933_vm6, %v921_v16, %v936_v27  ;;  %v941_v43 = vsel %vm933_vm6, %v924_v11, %v940_v37  ;;  %v944_v56 = vsel %vm934_vm5, %v930_v49, 1326507024 }
  0x96   :  { %v947_v34 = vshll.u32 %v907_v17, 8  ;;  %vm566_vm10 = vweird.f32 %v2034_v7  ;;  %vm1785_vm11 = vcmp.lt.s32.totalorder %v1784_v63, 0  ;;  %v665_v54 = vsel %vm580_vm2, %v664_v22, %v640_v53 }
  0x97   :  { %v942_v5 = vsel %vm932_vm7, %v939_v30, %v941_v43  ;;  %v945_v40 = vsel %vm933_vm6, %v927_v29, %v944_v56  ;;  %v649_v55 = vsel %vm1785_vm11, 0, %v1784_v63  ;;  %v938_v53 = vsel %vm932_vm7, %v935_v42, %v937_v2 }
  0x98   :  { %v946_v39 = vsel %vm932_vm7, %v943_v12, %v945_v40  ;;  %v2458_v33 = vmul.u32.u64.low %v947_v34, %v942_v5  ;;  %v2459_v47 = vmul.u32.u64.high %v947_v34, %v942_v5, %v2458_v33  ;;  %v650_v4 = vsub.s32 32, %v649_v55 }
  0x99   :  { %v651_v57 = vshll.u32 %v2396_v10, %v649_v55  ;;  %v654_v59 = vsub.s32 4294967266, %v649_v55  ;;  %vm573_vm12 = vcmp.eq.s32.totalorder %v2407_v21, 2  ;;  %vm778_vm13 = vcmp.lt.s32.totalorder %v2410_v41, 2 }
  0x9a   :  { %v2467_v1 = vmul.u32.u64.low %v947_v34, %v946_v39  ;;  %v2468_v8 = vmul.u32.u64.high %v947_v34, %v946_v39, %v2467_v1  ;;  %v652_v31 = vshrl.u32 %v634_v26, %v650_v4  ;;  %vm779_vm14 = vcmp.eq.s32.totalorder %v2410_v41, 0 }
  0x9b   :  { %v655_v15 = vadd.s32 127, %v654_v59  ;;  %vm782_vm15 = vcmp.eq.s32.totalorder %v2410_v41, 2  ;;  %v1882_v9 = vpop.eup %1881  ;;  %v2474_v10 = vsel %vm2423_vm4, 0, %v665_v54  ;;  %v954_v45 = vmul.u32 %v947_v34, %v938_v53 }
  0x9c   :  { %v957_v6 = vadd.s32 1, %v2459_v47  ;;  %v1018_v62 = vsub.s32 32, %v2394_v58  ;;  %v1884_v13 = vpop.eup %1883  ;;  %v574_v38 = vxor.u32 2147483648, %v1882_v9  ;;  %v653_v36 = vor.u32 %v652_v31, %v651_v57 }
  0x9d   :  { %v656_v35 = vshll.u32 %v655_v15, 23  ;;  %v1003_v16 = vand.u32 2147483647, %v2044_v20  ;;  %v571_v11 = vxor.u32 2147483648, %v1884_v13  ;;  %vm956_vm0 = vc.u32 %v2468_v8, %v2458_v33 }
  0x9e   :  { %v1020_v0 = vshll.u32 %v1981_v44, %v2394_v58  ;;  %v1023_v28 = vshll.u32 %v1982_v46, %v2394_v58  ;;  %v575_v29 = vsel %vm573_vm12, %v574_v38, %v1884_v13  ;;  %v660_v49 = vcvt.s32.f32 %v653_v36 }
  0x9f   :  { %v657_v17 = vor.u32 4788187, %v656_v35  ;;  %v784_v25 = vsel %vm782_vm15, %v574_v38, %v1884_v13  ;;  %v572_v22 = vsel %vm570_vm8, %v1882_v9, %v571_v11  ;;  %v781_v26 = vsel %vm779_vm14, %v1882_v9, %v571_v11 }
  0xa0   :  { %v958_v27 = vsel %vm956_vm0, %v957_v6, %v2459_v47  ;;  %v1021_v30 = vshrl.u32 %v1982_v46, %v1018_v62  ;;  %v576_v63 = vsel %vm569_vm9, %v572_v22, %v575_v29  ;;  %v785_v37 = vsel %vm778_vm13, %v781_v26, %v784_v25 }
  0xa1   :  { %v658_v42 = vand.u32 2147483647, %v657_v17  ;;  %v959_v12 = vadd.s32 %v958_v27, %v954_v45  ;;  %v577_v2 = vsel %vm566_vm10, nan, %v576_v63  ;;  %v786_v43 = vsel %vm566_vm10, nan, %v785_v37 }
  0xa2   :  { %v1010_v56 = vand.u32 8388607, %v1003_v16  ;;  %v1024_v34 = vshrl.u32 %v1983_v48, %v1018_v62  ;;  %682 = vst [vmem:[#allocation7 + $0x10] sm:$0xff] %v577_v2  ;;  %890 = vst [vmem:[#allocation7 + $0x30] sm:$0xff] %v786_v43  ;;  %v1026_v41 = vshll.u32 %v1983_v48, %v2394_v58  ;;  %v1027_v5 = vshrl.u32 %v1984_v50, %v1018_v62 }
  0xa3   :  { %v661_v54 = vmul.f32 %v660_v49, %v658_v42  ;;  %v960_v21 = vadd.s32 536870912, %v959_v12  ;;  %v1022_v40 = vor.u32 %v1021_v30, %v1020_v0  ;;  %v1029_v55 = vshll.u32 %v1984_v50, %v2394_v58 }
  0xa4   :  { %v1030_v7 = vshrl.u32 %v1985_v52, %v1018_v62  ;;  %v1032_v39 = vshll.u32 %v1985_v52, %v2394_v58  ;;  %v1025_v57 = vor.u32 %v1024_v34, %v1023_v28  ;;  %v1033_v59 = vshrl.u32 %v1986_v60, %v1018_v62 }
  0xa5   :  { %v662_v47 = vxor.u32 2147483648, %v661_v54  ;;  %v961_v4 = vshrl.u32 %v960_v21, 30  ;;  %v671_v53 = vadd.s32 3, %v2474_v10  ;;  %v1019_v1 = vshrl.u32 %v1981_v44, %v1018_v62 }
  0xa6   :  { %v1031_v31 = vor.u32 %v1030_v7, %v1029_v55  ;;  %vm1035_vm1 = vcmp.lt.s32.totalorder %v2382_v3, 1  ;;  %v1011_v45 = vor.u32 8388608, %v1010_v56  ;;  %v1028_v6 = vor.u32 %v1027_v5, %v1026_v41 }
  0xa7   :  { %v663_v15 = vsel %vm580_vm2, %v662_v47, %v661_v54  ;;  %v962_v9 = vshll.u32 %v961_v4, 30  ;;  %v1034_v13 = vor.u32 %v1033_v59, %v1032_v39  ;;  %vm1037_vm3 = vcmp.lt.s32.totalorder %v2382_v3, 3 }
  0xa8   :  { %v666_v58 = vsel %vm2423_vm4, %v2042_v19, %v663_v15  ;;  %vm1038_vm5 = vcmp.lt.s32.totalorder %v2382_v3, 4  ;;  %vm1036_vm6 = vcmp.lt.s32.totalorder %v2382_v3, 2  ;;  %v1043_v38 = vsel %vm1035_vm1, %v1022_v40, %v1025_v57 }
  0xa9   :  { %1885 = vcosq.f32 %v666_v58  ;;  %v2525_v62 = vsub.s32 %v959_v12, %v962_v9  ;;  %v2531_v36 = vshrl.u32 %v2377_v51, 5  ;;  %vm1439_vm2 = vcmp.gt.s32.totalorder %v2137_v61, 0 }
  0xaa   :  { %1887 = vsinq.f32 %v666_v58  ;;  %v1044_v24 = vsel %vm1038_vm5, %v1031_v31, 920167782  ;;  %v880_v35 = vand.u32 3, %v2474_v10  ;;  %v1040_v0 = vsel %vm1038_vm5, %v1028_v6, 2102212464 }
  0xab   :  { %v965_v11 = vsub.s32 0, %v2525_v62  ;;  %v1045_v28 = vsel %vm1037_vm3, %v1028_v6, %v1044_v24  ;;  %v1047_v17 = vsel %vm1035_vm1, %v1025_v57, %v1028_v6  ;;  %v1048_v49 = vsel %vm1038_vm5, %v1034_v13, 1326507024 }
  0xac   :  { %v1046_v29 = vsel %vm1036_vm6, %v1043_v38, %v1045_v28  ;;  %v1051_v25 = vshll.u32 %v1011_v45, 8  ;;  %v672_v22 = vand.u32 3, %v671_v53  ;;  %v1039_v10 = vsel %vm1035_vm1, %v1019_v1, %v1022_v40 }
  0xad   :  { %v1796_v26 = vmin.u32 %v965_v11, %v2525_v62  ;;  %v1049_v27 = vsel %vm1037_vm3, %v1031_v31, %v1048_v49  ;;  %v1041_v30 = vsel %vm1037_vm3, %v1025_v57, %v1040_v0  ;;  %v2556_v12 = vand.u32 31, %v2377_v51 }
  0xae   :  { %v1050_v63 = vsel %vm1036_vm6, %v1047_v17, %v1049_v27  ;;  %v2551_v42 = vmul.u32.u64.low %v1051_v25, %v1046_v29  ;;  %v2552_v37 = vmul.u32.u64.high %v1051_v25, %v1046_v29, %v2551_v42  ;;  %v2561_v2 = vsel %vm1439_vm2, %v2137_v61, 0 }
  0xaf   :  { %v967_v43 = vclz %v1796_v26  ;;  %v985_v56 = vsub.s32 4, %v961_v4  ;;  %vm670_vm4 = vweird.f32 %v2042_v19  ;;  %vm901_vm7 = vcmp.lt.s32.totalorder %v2038_v14, 0 }
  0xb0   :  { %v2565_v34 = vmul.u32.u64.low %v1051_v25, %v1050_v63  ;;  %v2566_v54 = vmul.u32.u64.high %v1051_v25, %v1050_v63, %v2565_v34  ;;  %vm881_vm8 = vcmp.lt.s32.totalorder %v880_v35, 2  ;;  %vm882_vm9 = vcmp.eq.s32.totalorder %v880_v35, 0 }
  0xb1   :  { %v1797_v21 = vadd.s32 4294967294, %v967_v43  ;;  %v1042_v51 = vsel %vm1036_vm6, %v1039_v10, %v1041_v30  ;;  %vm673_vm10 = vcmp.lt.s32.totalorder %v672_v22, 2  ;;  %vm674_vm11 = vcmp.eq.s32.totalorder %v672_v22, 0 }
  0xb2   :  { %vm885_vm12 = vcmp.eq.s32.totalorder %v880_v35, 2  ;;  %v1061_v61 = vadd.s32 1, %v2552_v37  ;;  %vm677_vm13 = vcmp.eq.s32.totalorder %v672_v22, 2  ;;  %v955_v5 = vadd.s32 %v2458_v33, %v2468_v8 }
  0xb3   :  { %v1886_v41 = vpop.eup %1885  ;;  %vm1798_vm14 = vcmp.lt.s32.totalorder %v1797_v21, 0  ;;  %v986_v40 = vsel %vm901_vm7, %v985_v56, %v961_v4  ;;  %v1058_v47 = vmul.u32 %v1051_v25, %v1042_v51  ;;  %vm1060_vm15 = vc.u32 %v2566_v54, %v2551_v42 }
  0xb4   :  { %v1888_v55 = vpop.eup %1887  ;;  %v678_v7 = vxor.u32 2147483648, %v1886_v41  ;;  %v970_v39 = vsel %vm1798_vm14, 0, %v1797_v21  ;;  %v1062_v33 = vsel %vm1060_vm15, %v1061_v61, %v2552_v37  ;;  %v1339_v8 = vsub.s32 32, %v2556_v12 }
  0xb5   :  { %v675_v3 = vxor.u32 2147483648, %v1888_v55  ;;  %v971_v57 = vsub.s32 32, %v970_v39  ;;  %v972_v59 = vshll.u32 %v2525_v62, %v970_v39  ;;  %v975_v53 = vsub.s32 4294967266, %v970_v39 }
  0xb6   :  { %v679_v1 = vsel %vm677_vm13, %v678_v7, %v1888_v55  ;;  %v887_v31 = vsel %vm885_vm12, %v678_v7, %v1888_v55  ;;  %vm2587_vm0 = vcmp.le.f32.partialorder %v899_v32, 0.7853982  ;;  %v1063_v62 = vadd.s32 %v1062_v33, %v1058_v47 }
  0xb7   :  { %v676_v4 = vsel %vm674_vm11, %v1886_v41, %v675_v3  ;;  %v884_v15 = vsel %vm882_vm9, %v1886_v41, %v675_v3  ;;  %v973_v9 = vshrl.u32 %v955_v5, %v971_v57  ;;  %v976_v45 = vadd.s32 127, %v975_v53 }
  0xb8   :  { %v680_v6 = vsel %vm673_vm10, %v676_v4, %v679_v1  ;;  %v888_v58 = vsel %vm881_vm8, %v884_v15, %v887_v31  ;;  %v988_v35 = vsel %vm2587_vm0, 0, %v986_v40  ;;  %v1064_v28 = vadd.s32 536870912, %v1063_v62 }
  0xb9   :  { %v681_v38 = vsel %vm670_vm4, nan, %v680_v6  ;;  %v889_v24 = vsel %vm670_vm4, nan, %v888_v58  ;;  %v974_v11 = vor.u32 %v973_v9, %v972_v59  ;;  %v977_v0 = vshll.u32 %v976_v45, 23 }
  0xba   :  { %683 = vst [vmem:[#allocation7 + $0x58] sm:$0xff] %v681_v38  ;;  %891 = vst [vmem:[#allocation7 + $0x78] sm:$0xff] %v889_v24  ;;  %v1324_v32 = vand.u32 2147483647, %v2040_v18  ;;  %v1341_v29 = vshll.u32 %v1981_v44, %v2556_v12  ;;  %v1342_v25 = vshrl.u32 %v1982_v46, %v1339_v8  ;;  %v1344_v19 = vshll.u32 %v1982_v46, %v2556_v12 }
  0xbb   :  { %v978_v17 = vor.u32 4788187, %v977_v0  ;;  %v981_v49 = vcvt.s32.f32 %v974_v11  ;;  %v2603_v22 = vshrl.u32 %v1064_v28, 30  ;;  %v1345_v26 = vshrl.u32 %v1983_v48, %v1339_v8 }
  0xbc   :  { %v1350_v10 = vshll.u32 %v1984_v50, %v2556_v12  ;;  %v1351_v27 = vshrl.u32 %v1985_v52, %v1339_v8  ;;  %v2610_v30 = vshrl.u32 %v2561_v2, 5  ;;  %v1347_v37 = vshll.u32 %v1983_v48, %v2556_v12 }
  0xbd   :  { %v979_v63 = vand.u32 2147483647, %v978_v17  ;;  %v1348_v43 = vshrl.u32 %v1984_v50, %v1339_v8  ;;  %v2616_v56 = vand.u32 31, %v2561_v2  ;;  %v992_v34 = vadd.s32 3, %v988_v35 }
  0xbe   :  { %v1066_v21 = vshll.u32 %v2603_v22, 30  ;;  %v1331_v51 = vand.u32 8388607, %v1324_v32  ;;  %v1352_v41 = vor.u32 %v1351_v27, %v1350_v10  ;;  %v1353_v5 = vshll.u32 %v1985_v52, %v2556_v12 }
  0xbf   :  { %v982_v61 = vmul.f32 %v981_v49, %v979_v63  ;;  %v1354_v40 = vshrl.u32 %v1986_v60, %v1339_v8  ;;  %v1343_v7 = vor.u32 %v1342_v25, %v1341_v29  ;;  %v1346_v39 = vor.u32 %v1345_v26, %v1344_v19 }
  0xc0   :  { %v2624_v55 = vsub.s32 %v1063_v62, %v1066_v21  ;;  %vm1359_vm1 = vcmp.lt.s32.totalorder %v2531_v36, 4  ;;  %v1340_v47 = vshrl.u32 %v1981_v44, %v1339_v8  ;;  %v1349_v3 = vor.u32 %v1348_v43, %v1347_v37 }
  0xc1   :  { %v983_v2 = vxor.u32 2147483648, %v982_v61  ;;  %vm1356_vm3 = vcmp.lt.s32.totalorder %v2531_v36, 1  ;;  %v2629_v57 = vand.u32 3, %v992_v34  ;;  %vm1005_vm5 = vcmp.lt.s32.totalorder %v2044_v20, 0 }
  0xc2   :  { %v1069_v12 = vsub.s32 0, %v2624_v55  ;;  %v1332_v59 = vor.u32 8388608, %v1331_v51  ;;  %vm1358_vm6 = vcmp.lt.s32.totalorder %v2531_v36, 3  ;;  %v1355_v1 = vor.u32 %v1354_v40, %v1353_v5 }
  0xc3   :  { %v984_v53 = vsel %vm901_vm7, %v983_v2, %v982_v61  ;;  %v1361_v31 = vsel %vm1359_vm1, %v1349_v3, 2102212464  ;;  %v1365_v33 = vsel %vm1359_vm1, %v1352_v41, 920167782  ;;  %vm1357_vm2 = vcmp.lt.s32.totalorder %v2531_v36, 2 }
  0xc4   :  { %v987_v8 = vsel %vm2587_vm0, %v2038_v14, %v984_v53  ;;  %v1800_v4 = vmin.u32 %v1069_v12, %v2624_v55  ;;  %v1364_v15 = vsel %vm1356_vm3, %v1343_v7, %v1346_v39  ;;  %vm2649_vm4 = vcmp.le.f32.partialorder %v1003_v16, 0.7853982 }
  0xc5   :  { %1889 = vcosq.f32 %v987_v8  ;;  %v1360_v45 = vsel %vm1356_vm3, %v1340_v47, %v1343_v7  ;;  %v1366_v6 = vsel %vm1358_vm6, %v1349_v3, %v1365_v33  ;;  %v1362_v13 = vsel %vm1358_vm6, %v1346_v39, %v1361_v31 }
  0xc6   :  { %1891 = vsinq.f32 %v987_v8  ;;  %v1071_v58 = vclz %v1800_v4  ;;  %v1368_v62 = vsel %vm1356_vm3, %v1346_v39, %v1349_v3  ;;  %v1089_v38 = vsub.s32 4, %v2603_v22 }
  0xc7   :  { %v1367_v16 = vsel %vm1357_vm2, %v1364_v15, %v1366_v6  ;;  %v1369_v24 = vsel %vm1359_vm1, %v1355_v1, 1326507024  ;;  %v1372_v11 = vshll.u32 %v1332_v59, 8  ;;  %vm995_vm7 = vcmp.eq.s32.totalorder %v2629_v57, 0 }
  0xc8   :  { %v1801_v0 = vadd.s32 4294967294, %v1071_v58  ;;  %v1202_v28 = vand.u32 3, %v988_v35  ;;  %v1370_v29 = vsel %vm1358_vm6, %v1352_v41, %v1369_v24  ;;  %vm994_vm8 = vcmp.lt.s32.totalorder %v2629_v57, 2 }
  0xc9   :  { %v1363_v17 = vsel %vm1357_vm2, %v1360_v45, %v1362_v13  ;;  %v1371_v49 = vsel %vm1357_vm2, %v1368_v62, %v1370_v29  ;;  %v2674_v25 = vmul.u32.u64.low %v1372_v11, %v1367_v16  ;;  %v2675_v19 = vmul.u32.u64.high %v1372_v11, %v1367_v16, %v2674_v25 }
  0xca   :  { %vm991_vm9 = vweird.f32 %v2038_v14  ;;  %v1059_v35 = vadd.s32 %v2551_v42, %v2566_v54  ;;  %vm1802_vm10 = vcmp.lt.s32.totalorder %v1801_v0, 0  ;;  %vm998_vm11 = vcmp.eq.s32.totalorder %v2629_v57, 2 }
  0xcb   :  { %v2681_v26 = vmul.u32.u64.low %v1372_v11, %v1371_v49  ;;  %v2682_v10 = vmul.u32.u64.high %v1372_v11, %v1371_v49, %v2681_v26  ;;  %v1074_v27 = vsel %vm1802_vm10, 0, %v1801_v0  ;;  %v1090_v36 = vsel %vm1005_vm5, %v1089_v38, %v2603_v22 }
  0xcc   :  { %v1443_v63 = vsub.s32 32, %v2616_v56  ;;  %v1075_v37 = vsub.s32 32, %v1074_v27  ;;  %v1076_v43 = vshll.u32 %v2624_v55, %v1074_v27  ;;  %v1079_v34 = vsub.s32 4294967266, %v1074_v27 }
  0xcd   :  { %v1379_v21 = vmul.u32 %v1372_v11, %v1363_v17  ;;  %vm1203_vm12 = vcmp.lt.s32.totalorder %v1202_v28, 2  ;;  %vm1204_vm13 = vcmp.eq.s32.totalorder %v1202_v28, 0  ;;  %vm1207_vm14 = vcmp.eq.s32.totalorder %v1202_v28, 2 }
  0xce   :  { %v1382_v42 = vadd.s32 1, %v2675_v19  ;;  %v1077_v54 = vshrl.u32 %v1059_v35, %v1075_v37  ;;  %v1080_v51 = vadd.s32 127, %v1079_v34  ;;  %v2693_v61 = vsel %vm2649_vm4, 0, %v1090_v36 }
  0xcf   :  { %vm1381_vm15 = vc.u32 %v2682_v10, %v2674_v25  ;;  %v1890_v22 = vpop.eup %1889  ;;  %v1428_v5 = vand.u32 2147483647, %v2047_v23  ;;  %v1445_v40 = vshll.u32 %v1981_v44, %v2616_v56  ;;  %v1446_v55 = vshrl.u32 %v1982_v46, %v1443_v63 }
  0xd0   :  { %v1383_v41 = vsel %vm1381_vm15, %v1382_v42, %v2675_v19  ;;  %v1892_v7 = vpop.eup %1891  ;;  %v999_v39 = vxor.u32 2147483648, %v1890_v22  ;;  %v1078_v2 = vor.u32 %v1077_v54, %v1076_v43  ;;  %v1081_v47 = vshll.u32 %v1080_v51, 23 }
  0xd1   :  { %v1384_v3 = vadd.s32 %v1383_v41, %v1379_v21  ;;  %v996_v12 = vxor.u32 2147483648, %v1892_v7  ;;  %v1448_v59 = vshll.u32 %v1982_v46, %v2616_v56  ;;  %v1449_v53 = vshrl.u32 %v1983_v48, %v1443_v63 }
  0xd2   :  { %v1451_v1 = vshll.u32 %v1983_v48, %v2616_v56  ;;  %v1000_v31 = vsel %vm998_vm11, %v999_v39, %v1892_v7  ;;  %v1082_v33 = vor.u32 4788187, %v1081_v47  ;;  %v1085_v8 = vcvt.s32.f32 %v1078_v2 }
  0xd3   :  { %v1209_v4 = vsel %vm1207_vm14, %v999_v39, %v1892_v7  ;;  %v997_v15 = vsel %vm995_vm7, %v1890_v22, %v996_v12  ;;  %v1206_v45 = vsel %vm1204_vm13, %v1890_v22, %v996_v12  ;;  %v1385_v6 = vadd.s32 536870912, %v1384_v3 }
  0xd4   :  { %v1452_v46 = vshrl.u32 %v1984_v50, %v1443_v63  ;;  %v1001_v58 = vsel %vm994_vm8, %v997_v15, %v1000_v31  ;;  %v1083_v13 = vand.u32 2147483647, %v1082_v33  ;;  %v1210_v48 = vsel %vm1203_vm12, %v1206_v45, %v1209_v4 }
  0xd5   :  { %v1454_v62 = vshll.u32 %v1984_v50, %v2616_v56  ;;  %v1002_v38 = vsel %vm991_vm9, nan, %v1001_v58  ;;  %v1211_v16 = vsel %vm991_vm9, nan, %v1210_v48  ;;  %v2723_v24 = vshrl.u32 %v1385_v6, 30 }
  0xd6   :  { %v1455_v11 = vshrl.u32 %v1985_v52, %v1443_v63  ;;  %1107 = vst [vmem:[#allocation7 + $0x18] sm:$0xff] %v1002_v38  ;;  %v1086_v0 = vmul.f32 %v1085_v8, %v1083_v13  ;;  %1315 = vst [vmem:[#allocation7 + $0x38] sm:$0xff] %v1211_v16  ;;  %v1435_v57 = vand.u32 8388607, %v1428_v5  ;;  %v1457_v28 = vshll.u32 %v1985_v52, %v2616_v56 }
  0xd7   :  { %v1458_v50 = vshrl.u32 %v1986_v60, %v1443_v63  ;;  %v1387_v29 = vshll.u32 %v2723_v24, 30  ;;  %v1444_v14 = vshrl.u32 %v1981_v44, %v1443_v63  ;;  %v1447_v17 = vor.u32 %v1446_v55, %v1445_v40 }
  0xd8   :  { %v1450_v49 = vor.u32 %v1449_v53, %v1448_v59  ;;  %v1087_v19 = vxor.u32 2147483648, %v1086_v0  ;;  %v1456_v35 = vor.u32 %v1455_v11, %v1454_v62  ;;  %vm1460_vm0 = vcmp.lt.s32.totalorder %v2610_v30, 1 }
  0xd9   :  { %v1459_v26 = vor.u32 %v1458_v50, %v1457_v28  ;;  %v1096_v27 = vadd.s32 3, %v2693_v61  ;;  %v1388_v36 = vsub.s32 %v1384_v3, %v1387_v29  ;;  %v1453_v37 = vor.u32 %v1452_v46, %v1451_v1 }
  0xda   :  { %vm1463_vm1 = vcmp.lt.s32.totalorder %v2610_v30, 4  ;;  %v1088_v52 = vsel %vm1005_vm5, %v1087_v19, %v1086_v0  ;;  %v1436_v60 = vor.u32 8388608, %v1435_v57  ;;  %vm1461_vm3 = vcmp.lt.s32.totalorder %v2610_v30, 2 }
  0xdb   :  { %vm1462_vm6 = vcmp.lt.s32.totalorder %v2610_v30, 3  ;;  %v1091_v44 = vsel %vm2649_vm4, %v2044_v20, %v1088_v52  ;;  %v1390_v56 = vsub.s32 0, %v1388_v36  ;;  %v1465_v63 = vsel %vm1463_vm1, %v1453_v37, 2102212464 }
  0xdc   :  { %v1468_v43 = vsel %vm1460_vm0, %v1447_v17, %v1450_v49  ;;  %1893 = vcosq.f32 %v1091_v44  ;;  %v1464_v34 = vsel %vm1460_vm0, %v1444_v14, %v1447_v17  ;;  %v1469_v21 = vsel %vm1463_vm1, %v1456_v35, 920167782 }
  0xdd   :  { %v1473_v42 = vsel %vm1463_vm1, %v1459_v26, 1326507024  ;;  %1895 = vsinq.f32 %v1091_v44  ;;  %v1813_v54 = vmin.u32 %v1390_v56, %v1388_v36  ;;  %v1470_v51 = vsel %vm1462_vm6, %v1453_v37, %v1469_v21 }
  0xde   :  { %v1472_v22 = vsel %vm1460_vm0, %v1450_v49, %v1453_v37  ;;  %v1466_v41 = vsel %vm1462_vm6, %v1450_v49, %v1465_v63  ;;  %v1471_v9 = vsel %vm1461_vm3, %v1468_v43, %v1470_v51  ;;  %v1474_v40 = vsel %vm1462_vm6, %v1456_v35, %v1473_v42 }
  0xdf   :  { %v1476_v55 = vshll.u32 %v1436_v60, 8  ;;  %v1392_v7 = vclz %v1813_v54  ;;  %v1305_v39 = vand.u32 3, %v2693_v61  ;;  %v1475_v2 = vsel %vm1461_vm3, %v1472_v22, %v1474_v40 }
  0xe0   :  { %v1467_v59 = vsel %vm1461_vm3, %v1464_v34, %v1466_v41  ;;  %v1097_v31 = vand.u32 3, %v1096_v27  ;;  %v1380_v33 = vadd.s32 %v2674_v25, %v2682_v10  ;;  %vm1095_vm2 = vweird.f32 %v2044_v20 }
  0xe1   :  { %v2754_v47 = vmul.u32.u64.low %v1476_v55, %v1471_v9  ;;  %v2755_v3 = vmul.u32.u64.high %v1476_v55, %v1471_v9, %v2754_v47  ;;  %v1814_v12 = vadd.s32 4294967294, %v1392_v7  ;;  %v1483_v8 = vmul.u32 %v1476_v55, %v1467_v59 }
  0xe2   :  { %v2760_v53 = vmul.u32.u64.low %v1476_v55, %v1475_v2  ;;  %v2761_v1 = vmul.u32.u64.high %v1476_v55, %v1475_v2, %v2760_v53  ;;  %vm1307_vm4 = vcmp.eq.s32.totalorder %v1305_v39, 0  ;;  %vm1099_vm7 = vcmp.eq.s32.totalorder %v1097_v31, 0 }
  0xe3   :  { %vm1815_vm5 = vcmp.lt.s32.totalorder %v1814_v12, 0  ;;  %v1486_v4 = vadd.s32 1, %v2755_v3  ;;  %vm1102_vm8 = vcmp.eq.s32.totalorder %v1097_v31, 2  ;;  %vm1310_vm9 = vcmp.eq.s32.totalorder %v1305_v39, 2 }
  0xe4   :  { %v1395_v61 = vsel %vm1815_vm5, 0, %v1814_v12  ;;  %vm1485_vm10 = vc.u32 %v2761_v1, %v2754_v47  ;;  %vm1098_vm11 = vcmp.lt.s32.totalorder %v1097_v31, 2  ;;  %vm1306_vm12 = vcmp.lt.s32.totalorder %v1305_v39, 2 }
  0xe5   :  { %v1396_v15 = vsub.s32 32, %v1395_v61  ;;  %v1397_v45 = vshll.u32 %v1388_v36, %v1395_v61  ;;  %v1400_v6 = vsub.s32 4294967266, %v1395_v61  ;;  %v1487_v13 = vsel %vm1485_vm10, %v1486_v4, %v2755_v3 }
  0xe6   :  { %v1894_v30 = vpop.eup %1893  ;;  %v1488_v62 = vadd.s32 %v1487_v13, %v1483_v8  ;;  %v1410_v36 = vsub.s32 4, %v2723_v24  ;;  %vm1326_vm13 = vcmp.lt.s32.totalorder %v2040_v18, 0  ;;  %vm1325_vm14 = vcmp.le.f32.partialorder %v1324_v32, 0.7853982 }
  0xe7   :  { %v1896_v46 = vpop.eup %1895  ;;  %v1103_v25 = vxor.u32 2147483648, %v1894_v30  ;;  %v1398_v10 = vshrl.u32 %v1380_v33, %v1396_v15  ;;  %v1401_v58 = vadd.s32 127, %v1400_v6  ;;  %v1484_v22 = vadd.s32 %v2754_v47, %v2761_v1 }
  0xe8   :  { %v1100_v48 = vxor.u32 2147483648, %v1896_v46  ;;  %v1489_v50 = vadd.s32 536870912, %v1488_v62  ;;  %v1411_v20 = vsel %vm1326_vm13, %v1410_v36, %v2723_v24  ;;  %vm1416_vm5 = vweird.f32 %v2040_v18 }
  0xe9   :  { %v1104_v38 = vsel %vm1102_vm8, %v1103_v25, %v1896_v46  ;;  %v1312_v16 = vsel %vm1310_vm9, %v1103_v25, %v1896_v46  ;;  %v1399_v11 = vor.u32 %v1398_v10, %v1397_v45  ;;  %v1402_v0 = vshll.u32 %v1401_v58, 23 }
  0xea   :  { %v1101_v57 = vsel %vm1099_vm7, %v1894_v30, %v1100_v48  ;;  %v1309_v28 = vsel %vm1307_vm4, %v1894_v30, %v1100_v48  ;;  %v2776_v26 = vshrl.u32 %v1489_v50, 30  ;;  %v1413_v34 = vsel %vm1325_vm14, 0, %v1411_v20 }
  0xeb   :  { %v1105_v29 = vsel %vm1098_vm11, %v1101_v57, %v1104_v38  ;;  %v1313_v14 = vsel %vm1306_vm12, %v1309_v28, %v1312_v16  ;;  %v1403_v17 = vor.u32 4788187, %v1402_v0  ;;  %v1406_v49 = vcvt.s32.f32 %v1399_v11 }
  0xec   :  { %v1106_v19 = vsel %vm1095_vm2, nan, %v1105_v29  ;;  %v1314_v35 = vsel %vm1095_vm2, nan, %v1313_v14  ;;  %v1491_v37 = vshll.u32 %v2776_v26, 30  ;;  %v1417_v54 = vadd.s32 3, %v1413_v34 }
  0xed   :  { %1108 = vst [vmem:[#allocation7 + $0x60] sm:$0xff] %v1106_v19  ;;  %1316 = vst [vmem:[#allocation7 + $0x80] sm:$0xff] %v1314_v35  ;;  %v1404_v27 = vand.u32 2147483647, %v1403_v17  ;;  %v1627_v9 = vand.u32 3, %v1413_v34  ;;  %v1514_v6 = vsub.s32 4, %v2776_v26 }
  0xee   :  { %v1492_v60 = vsub.s32 %v1488_v62, %v1491_v37  ;;  %v1418_v41 = vand.u32 3, %v1417_v54  ;;  %vm1430_vm7 = vcmp.lt.s32.totalorder %v2047_v23, 0  ;;  %vm1429_vm8 = vcmp.le.f32.partialorder %v1428_v5, 0.7853982 }
  0xef   :  { %v1407_v52 = vmul.f32 %v1406_v49, %v1404_v27  ;;  %vm1632_vm3 = vcmp.eq.s32.totalorder %v1627_v9, 2  ;;  %vm1629_vm6 = vcmp.eq.s32.totalorder %v1627_v9, 0  ;;  %vm1628_vm4 = vcmp.lt.s32.totalorder %v1627_v9, 2 }
  0xf0   :  { %v1494_v56 = vsub.s32 0, %v1492_v60  ;;  %vm1420_vm0 = vcmp.eq.s32.totalorder %v1418_v41, 0  ;;  %vm1423_vm1 = vcmp.eq.s32.totalorder %v1418_v41, 2  ;;  %vm1419_vm2 = vcmp.lt.s32.totalorder %v1418_v41, 2 }
  0xf1   :  { %v1408_v44 = vxor.u32 2147483648, %v1407_v52  ;;  %v1515_v58 = vsel %vm1430_vm7, %v1514_v6, %v2776_v26 }
  0xf2   :  { %v1817_v21 = vmin.u32 %v1494_v56, %v1492_v60  ;;  %v1517_v62 = vsel %vm1429_vm8, 0, %v1515_v58 }
  0xf3   :  { %v1409_v63 = vsel %vm1326_vm13, %v1408_v44, %v1407_v52  ;;  %v1521_v38 = vadd.s32 3, %v1517_v62  ;;  %v1730_v11 = vand.u32 3, %v1517_v62 }
  0xf4   :  { %v1412_v43 = vsel %vm1325_vm14, %v2040_v18, %v1409_v63  ;;  %v1496_v42 = vclz %v1817_v21 }
  0xf5   :  { %1897 = vcosq.f32 %v1412_v43  ;;  %v1522_v16 = vand.u32 3, %v1521_v38  ;;  %vm1735_vm10 = vcmp.eq.s32.totalorder %v1730_v11, 2  ;;  %vm1732_vm12 = vcmp.eq.s32.totalorder %v1730_v11, 0 }
  0xf6   :  { %1899 = vsinq.f32 %v1412_v43  ;;  %v1818_v51 = vadd.s32 4294967294, %v1496_v42  ;;  %vm1731_vm14 = vcmp.lt.s32.totalorder %v1730_v11, 2 }
  0xf7   :  { %vm1527_vm9 = vcmp.eq.s32.totalorder %v1522_v16, 2  ;;  %vm1524_vm11 = vcmp.eq.s32.totalorder %v1522_v16, 0  ;;  %vm1523_vm13 = vcmp.lt.s32.totalorder %v1522_v16, 2 }
  0xf8   :  { %vm1819_vm15 = vcmp.lt.s32.totalorder %v1818_v51, 0 }
  0xf9   :  { %v1499_v32 = vsel %vm1819_vm15, 0, %v1818_v51  ;;  %vm1520_vm15 = vweird.f32 %v2047_v23 }
  0xfa   :  { %v1500_v40 = vsub.s32 32, %v1499_v32  ;;  %v1501_v24 = vshll.u32 %v1492_v60, %v1499_v32  ;;  %v1504_v55 = vsub.s32 4294967266, %v1499_v32 }
  0xfc   :  { %v1502_v7 = vshrl.u32 %v1484_v22, %v1500_v40  ;;  %v1505_v39 = vadd.s32 127, %v1504_v55 }
  0xfe   :  { %v1503_v59 = vor.u32 %v1502_v7, %v1501_v24  ;;  %v1506_v53 = vshll.u32 %v1505_v39, 23 }
  0xff   :  { %v1898_v2 = vpop.eup %1897 }
 0x100   :  { %v1900_v3 = vpop.eup %1899  ;;  %v1424_v12 = vxor.u32 2147483648, %v1898_v2  ;;  %v1507_v31 = vor.u32 4788187, %v1506_v53  ;;  %v1510_v33 = vcvt.s32.f32 %v1503_v59 }
 0x101   :  { %v1421_v47 = vxor.u32 2147483648, %v1900_v3 }
 0x102   :  { %v1425_v1 = vsel %vm1423_vm1, %v1424_v12, %v1900_v3  ;;  %v1634_v61 = vsel %vm1632_vm3, %v1424_v12, %v1900_v3  ;;  %v1508_v45 = vand.u32 2147483647, %v1507_v31 }
 0x103   :  { %v1422_v8 = vsel %vm1420_vm0, %v1898_v2, %v1421_v47  ;;  %v1631_v4 = vsel %vm1629_vm6, %v1898_v2, %v1421_v47 }
 0x104   :  { %v1426_v15 = vsel %vm1419_vm2, %v1422_v8, %v1425_v1  ;;  %v1635_v30 = vsel %vm1628_vm4, %v1631_v4, %v1634_v61  ;;  %v1511_v10 = vmul.f32 %v1510_v33, %v1508_v45 }
 0x105   :  { %v1427_v46 = vsel %vm1416_vm5, nan, %v1426_v15  ;;  %v1636_v25 = vsel %vm1416_vm5, nan, %v1635_v30 }
 0x106   :  { %1532 = vst [vmem:[#allocation7 + $0x20] sm:$0xff] %v1427_v46  ;;  %1740 = vst [vmem:[#allocation7 + $0x40] sm:$0xff] %v1636_v25  ;;  %v1512_v18 = vxor.u32 2147483648, %v1511_v10 }
 0x108   :  { %v1513_v13 = vsel %vm1430_vm7, %v1512_v18, %v1511_v10 }
 0x109   :  { %v1516_v48 = vsel %vm1429_vm8, %v2047_v23, %v1513_v13 }
 0x10a   :  { %1901 = vcosq.f32 %v1516_v48 }
 0x10b   :  { %1903 = vsinq.f32 %v1516_v48 }
 0x114   :  { %v1902_v0 = vpop.eup %1901 }
 0x115   :  { %v1904_v57 = vpop.eup %1903  ;;  %v1528_v28 = vxor.u32 2147483648, %v1902_v0 }
 0x116   :  { %v1525_v5 = vxor.u32 2147483648, %v1904_v57 }
 0x117   :  { %v1529_v50 = vsel %vm1527_vm9, %v1528_v28, %v1904_v57  ;;  %v1737_v29 = vsel %vm1735_vm10, %v1528_v28, %v1904_v57 }
 0x118   :  { %v1526_v14 = vsel %vm1524_vm11, %v1902_v0, %v1525_v5  ;;  %v1734_v17 = vsel %vm1732_vm12, %v1902_v0, %v1525_v5 }
 0x119   :  { %v1530_v49 = vsel %vm1523_vm13, %v1526_v14, %v1529_v50  ;;  %v1738_v19 = vsel %vm1731_vm14, %v1734_v17, %v1737_v29 }
 0x11a   :  { %v1531_v35 = vsel %vm1520_vm15, nan, %v1530_v49  ;;  %v1739_v26 = vsel %vm1520_vm15, nan, %v1738_v19 }
 0x11b   :  { %1533 = vst [vmem:[#allocation7 + $0x68] sm:$0xff] %v1531_v35  ;;  %1741 = vst [vmem:[#allocation7 + $0x88] sm:$0xff] %v1739_v26 }
 0x11c   :  { %1960 = shalt.err (!%p1957_p6)
}
 0x11d   :  { %s1961_s10 = scalar_lea.hbm %s2810_s2, 2304 }
 0x11e   :  { %p1962_p7 = scmp.ne.s32.totalorder %s2810_s2, %s1961_s10  ;;  %p1965_p8 = scmp.lt.u32.totalorder %s1961_s10, %s2810_s2 }
 0x120   :  { %p1967_p9 = pnand %p1965_p8, %p1962_p7 }
 0x122   :  { %1970 = shalt.err (!%p1967_p9)
}
 0x123   :  { %s1988_s15 = smov 1152   ;;  %s1989_s16 = smov 72  }
 0x124   :  { %1753 = dma.vmem_to_hbm [thread:$0]  %s1748_s6, 2304, %s2810_s2, [#allocation4], %s1988_s15, %s1988_s15, %s1989_s16  }
 0x125   :  { %1975 = dma.done.wait [#allocation4], 2304  }
 0x126   :  { %1976 = vsyncadd [#allocation4], 4294964992 }
 0x127   :  { %1757 = vsyncpa [#allocation3], 1 }
 0x128   :  { %1758 = vsyncpa [#allocation6], 1 }
 0x129   :  { %1759 = vsyncpa [#allocation4], 1 }

</bundles_post_ra>
